<compile_context>
chip_gen: v7x
topology: tpu7x:2x2x1
jax: 0.10.0
libtpu: 0.0.40
codegen_flags: <defaults>
</compile_context>

<pallas_src>
import jax
import jax.numpy as jnp
from jax.experimental import pallas as pl
from jax.experimental.pallas import tpu as pltpu


_VMEM = pl.BlockSpec(memory_space=pltpu.MemorySpace.VMEM)


# ----------------------------------------------------------------------------
# Fused bidirectional RNN layer kernel
# ----------------------------------------------------------------------------
def _make_birnn_layer_kernel(is_last: bool, unroll):
    """Fused fw+bw vanilla-RNN (tanh) layer, optionally fused with the final fc.

    Ref layout (rows flattened time-major: row = t*BP + b):
      inputs  : x        (T*BP, Din)   previous layer slab ([fw|bw] for l>0)
                w_cat    (Din, 2H)     [W_ih_fw^T | W_ih_bw^T]  (f32 or bf16)
                whh_fw, whh_bw (H, H)  hidden->hidden (transposed)
                b_cat    (1, 2H)       [b_ih_fw+b_hh_fw | b_ih_bw+b_hh_bw]
                [fcw_fw, fcw_bw (H,O), fcb (1,O)]  only when is_last
      outputs : is_last: out (BP,O), h_fw (BP,H), h_bw (BP,H)
                else   : y (T*BP, 2H), h_fw (BP,H), h_bw (BP,H)
      scratch : xp (T*BP, 2H) f32 hoisted projections [, hbw0 (BP,H) if last]
    """

    def kernel(*args):
        if is_last:
            (x_ref, w_ref, whhf_ref, whhb_ref, b_ref,
             fcwf_ref, fcwb_ref, fcb_ref,
             out_ref, hfw_ref, hbw_ref,
             xp_ref, hbw0_ref) = args
        else:
            (x_ref, w_ref, whhf_ref, whhb_ref, b_ref,
             y_ref, hfw_ref, hbw_ref,
             xp_ref) = args

        BP, H = hfw_ref.shape
        T = xp_ref.shape[0] // BP

        # (1) Hoisted input projection for BOTH directions: one GEMM with
        #     N = 2H, lane-dense (T*BP, 2H) store, combined bias folded in.
        #     GEMM operands may be bf16 (weights pre-cast in the wrapper,
        #     activations cast at use); accumulation stays f32.
        w = w_ref[...]
        xe = x_ref[...]
        if xe.dtype != w.dtype:
            xe = xe.astype(w.dtype)
        xp_ref[...] = (jnp.dot(xe, w, preferred_element_type=jnp.float32)
                       + b_ref[...])

        # (2) Loop-invariant weight loads hoisted out of the recurrence.
        whh_fw = whhf_ref[...]
        whh_bw = whhb_ref[...]

        def rec(h, w_hh):
            # f32 carry, operand cast at use so the MXU runs its native dtype
            return jnp.dot(h.astype(w_hh.dtype), w_hh,
                           preferred_element_type=jnp.float32)

        # (3) Peeled first step: initial hidden state is zero, so no h @ W_hh
        #     matmul is needed; the bw state at original t = T-1 (needed by the
        #     fused fc) is captured here, removing the per-step select.
        rb0 = pl.multiple_of((T - 1) * BP, BP)
        h_fw = jnp.tanh(xp_ref[pl.ds(0, BP), pl.ds(0, H)])
        h_bw = jnp.tanh(xp_ref[pl.ds(rb0, BP), pl.ds(H, H)])
        if is_last:
            hbw0_ref[...] = h_bw                    # bw state at t = T-1
        else:
            y_ref[pl.ds(0, BP), pl.ds(0, H)] = h_fw
            y_ref[pl.ds(rb0, BP), pl.ds(H, H)] = h_bw

        # (4) Remaining T-1 steps of the fused fw/bw recurrence.
        def step(i, carry):
            h_fw, h_bw = carry
            rf = pl.multiple_of(i * BP, BP)           # fw processes t = i
            rb = pl.multiple_of((T - 1 - i) * BP, BP)  # bw processes t = T-1-i
            h_fw = jnp.tanh(xp_ref[pl.ds(rf, BP), pl.ds(0, H)]
                            + rec(h_fw, whh_fw))
            h_bw = jnp.tanh(xp_ref[pl.ds(rb, BP), pl.ds(H, H)]
                            + rec(h_bw, whh_bw))
            if not is_last:
                y_ref[pl.ds(rf, BP), pl.ds(0, H)] = h_fw
                y_ref[pl.ds(rb, BP), pl.ds(H, H)] = h_bw
            return h_fw, h_bw

        h_fw, h_bw = jax.lax.fori_loop(1, T, step, (h_fw, h_bw),
                                       unroll=unroll)

        hfw_ref[...] = h_fw
        hbw_ref[...] = h_bw
        if is_last:
            # (5) Fused fc: out = [h_fw(T-1) | h_bw(T-1)] @ fc_w.T + fc_b with
            #     fc_w pre-split per direction (no lane concat needed).
            out_ref[...] = (
                jnp.dot(h_fw, fcwf_ref[...],
                        preferred_element_type=jnp.float32)
                + jnp.dot(hbw0_ref[...], fcwb_ref[...],
                          preferred_element_type=jnp.float32)
                + fcb_ref[...])

    return kernel


def _layer_vmem_limit(T, BP, Din, H, O, is_last, wt_bytes):
    """Per-layer VMEM budget (2x headroom over actual buffer footprint)."""
    f32 = 4
    fp = (T * BP * Din * f32            # input slab (f32)
          + Din * 2 * H * wt_bytes      # combined W_ih
          + 2 * H * H * wt_bytes        # W_hh fw/bw
          + 2 * H * f32                 # combined bias
          + T * BP * 2 * H * f32        # xp scratch
          + 2 * BP * H * f32)           # hn outputs
    if is_last:
        fp += 2 * H * O * f32 + O * f32 + BP * O * f32 + BP * H * f32
    else:
        fp += T * BP * 2 * H * f32      # (T*BP, 2H) sequence output
    return int(min(max(2 * fp, 32 * 1024 * 1024), 100 * 1024 * 1024))


# ----------------------------------------------------------------------------
# Wrapper: matches BiRNN.forward -> (fc(out[:, -1, :]), hn)
# ----------------------------------------------------------------------------
def birnn_forward(x, params, *, compute_dtype=jnp.float32):
    B, T, _ = x.shape
    H = params["hidden_size"]
    L = params["num_layers"]
    O = params["fc_w"].shape[0]
    BP = ((B + 7) // 8) * 8                  # pad batch to a sublane multiple
    unroll = True if T <= 16 else 8          # full unroll only for small T
    wt_bytes = jnp.dtype(compute_dtype).itemsize

    # Single wrapper-side layout pass on the raw input only:
    # batch-first -> time-major, zero-pad batch, flatten rows as (t, b) -> t*BP+b.
    x_tm = jnp.transpose(x, (1, 0, 2))
    if BP != B:
        x_tm = jnp.pad(x_tm, ((0, 0), (0, BP - B), (0, 0)))
    slab = x_tm.reshape(T * BP, -1)          # (T*BP, Din) f32

    hn_list = []
    out = None
    for l in range(L):
        p = params["rnn"][l]
        is_last = (l == L - 1)
        Din = slab.shape[1]

        # combined [fw | bw] input->hidden weight, (Din, 2H); K-order matches
        # the [fw | bw] lane order of the previous layer's slab.
        w_cat = jnp.concatenate(
            [jnp.transpose(p["w_ih_fw"]), jnp.transpose(p["w_ih_bw"])],
            axis=1).astype(compute_dtype)
        whh_fw = jnp.transpose(p["w_hh_fw"]).astype(compute_dtype)
        whh_bw = jnp.transpose(p["w_hh_bw"]).astype(compute_dtype)
        b_cat = jnp.concatenate(
            [p["b_ih_fw"] + p["b_hh_fw"], p["b_ih_bw"] + p["b_hh_bw"]]
        ).reshape(1, 2 * H).astype(jnp.float32)

        kernel = _make_birnn_layer_kernel(is_last, unroll)
        cparams = pltpu.CompilerParams(
            vmem_limit_bytes=_layer_vmem_limit(T, BP, Din, H, O, is_last,
                                               wt_bytes))
        common = (slab, w_cat, whh_fw, whh_bw, b_cat)

        if is_last:
            fcw_fw = jnp.transpose(params["fc_w"][:, :H])      # (H, O)
            fcw_bw = jnp.transpose(params["fc_w"][:, H:])      # (H, O)
            fc_b = params["fc_b"].reshape(1, O)
            out_p, h_fw, h_bw = pl.pallas_call(
                kernel,
                out_shape=(jax.ShapeDtypeStruct((BP, O), jnp.float32),
                           jax.ShapeDtypeStruct((BP, H), jnp.float32),
                           jax.ShapeDtypeStruct((BP, H), jnp.float32)),
                in_specs=[_VMEM] * (len(common) + 3),
                out_specs=(_VMEM, _VMEM, _VMEM),
                scratch_shapes=[pltpu.VMEM((T * BP, 2 * H), jnp.float32),
                                pltpu.VMEM((BP, H), jnp.float32)],
                compiler_params=cparams,
            )(*common, fcw_fw, fcw_bw, fc_b)
            out = out_p[:B]
        else:
            y, h_fw, h_bw = pl.pallas_call(
                kernel,
                out_shape=(jax.ShapeDtypeStruct((T * BP, 2 * H), jnp.float32),
                           jax.ShapeDtypeStruct((BP, H), jnp.float32),
                           jax.ShapeDtypeStruct((BP, H), jnp.float32)),
                in_specs=[_VMEM] * len(common),
                out_specs=(_VMEM, _VMEM, _VMEM),
                scratch_shapes=[pltpu.VMEM((T * BP, 2 * H), jnp.float32)],
                compiler_params=cparams,
            )(*common)
            slab = y                          # single [fw | bw] slab to next layer

        hn_list.append(h_fw[:B])
        hn_list.append(h_bw[:B])

    hn = jnp.stack(hn_list, axis=0)           # (num_layers*2, B, H)
    return out, hn


# ----------------------------------------------------------------------------
# Deterministic parameter init (PyTorch-style uniform(-1/sqrt(H), 1/sqrt(H)))
# ----------------------------------------------------------------------------
def init_params(key, input_size, hidden_size, num_layers, output_size):
    H = hidden_size
    bound = 1.0 / jnp.sqrt(jnp.float32(H))

    def uni(k, shape, b=bound):
        return jax.random.uniform(k, shape, jnp.float32, -b, b)

    rnn_layers = []
    for l in range(num_layers):
        d_in = input_size if l == 0 else 2 * H
        key, *ks = jax.random.split(key, 9)
        rnn_layers.append(
            dict(
                w_ih_fw=uni(ks[0], (H, d_in)),
                w_hh_fw=uni(ks[1], (H, H)),
                b_ih_fw=uni(ks[2], (H,)),
                b_hh_fw=uni(ks[3], (H,)),
                w_ih_bw=uni(ks[4], (H, d_in)),
                w_hh_bw=uni(ks[5], (H, H)),
                b_ih_bw=uni(ks[6], (H,)),
                b_hh_bw=uni(ks[7], (H,)),
            )
        )
    key, k1, k2 = jax.random.split(key, 3)
    fc_bound = 1.0 / jnp.sqrt(jnp.float32(2 * H))
    fc_w = uni(k1, (output_size, 2 * H), fc_bound)
    fc_b = uni(k2, (output_size,), fc_bound)
    return dict(num_layers=num_layers, hidden_size=hidden_size,
                rnn=rnn_layers, fc_w=fc_w, fc_b=fc_b)


# ----------------------------------------------------------------------------
# Pure-JAX reference for validation
# ----------------------------------------------------------------------------
def _ref_rnn_direction(x_tbd, w_ih, w_hh, b_ih, b_hh):
    H = w_hh.shape[0]
    B = x_tbd.shape[1]

    def step(h, x_t):
        h_new = jnp.tanh(x_t @ w_ih.T + h @ w_hh.T + b_ih + b_hh)
        return h_new, h_new

    h_fin, ys = jax.lax.scan(step, jnp.zeros((B, H), jnp.float32), x_tbd)
    return ys, h_fin


def birnn_forward_ref(x, params):
    L = params["num_layers"]
    layer_in = jnp.transpose(x, (1, 0, 2))
    hn_list = []
    for l in range(L):
        p = params["rnn"][l]
        y_fw, h_fw = _ref_rnn_direction(
            layer_in, p["w_ih_fw"], p["w_hh_fw"], p["b_ih_fw"], p["b_hh_fw"])
        y_bw_rev, h_bw = _ref_rnn_direction(
            layer_in[::-1], p["w_ih_bw"], p["w_hh_bw"], p["b_ih_bw"], p["b_hh_bw"])
        layer_in = jnp.concatenate([y_fw, y_bw_rev[::-1]], axis=-1)
        hn_list.append(h_fw)
        hn_list.append(h_bw)
    last = jnp.transpose(layer_in, (1, 0, 2))[:, -1, :]
    out = last @ params["fc_w"].T + params["fc_b"]
    return out, jnp.stack(hn_list, axis=0)


# ----------------------------------------------------------------------------
if __name__ == "__main__":
    B, T = 2, 8
    input_size, hidden_size, num_layers, output_size = 16, 32, 2, 10

    key = jax.random.PRNGKey(0)
    k_x, k_p = jax.random.split(key)
    x = jax.random.normal(k_x, (B, T, input_size), dtype=jnp.float32)
    params = init_params(k_p, input_size, hidden_size, num_layers, output_size)

    ref_out, ref_hn = birnn_forward_ref(x, params)

    # f32 MXU-operand path (tight tolerance vs. pure-JAX reference)
    out, hn = birnn_forward(x, params, compute_dtype=jnp.float32)
    out = jax.block_until_ready(out)
    hn = jax.block_until_ready(hn)
    assert out.shape == (B, output_size)
    assert hn.shape == (num_layers * 2, B, hidden_size)
    assert jnp.allclose(out, ref_out, atol=1e-3, rtol=1e-3)
    assert jnp.allclose(hn, ref_hn, atol=1e-3, rtol=1e-3)

    # bf16 MXU-operand path (f32 accumulation / f32 carry), looser tolerance
    out_bf, hn_bf = birnn_forward(x, params, compute_dtype=jnp.bfloat16)
    out_bf = jax.block_until_ready(out_bf)
    hn_bf = jax.block_until_ready(hn_bf)
    assert jnp.allclose(out_bf, ref_out, atol=1e-1, rtol=1e-1)
    assert jnp.allclose(hn_bf, ref_hn, atol=1e-1, rtol=1e-1)

    print("KERNEL_OK")
</pallas_src>

<mosaic_0001>
module attributes {stable_mosaic.version = 11 : i64} {
  func.func @kernel(%arg0: memref<64x16xf32, #tpu.memory_space<vmem>>, %arg1: memref<16x64xf32, #tpu.memory_space<vmem>>, %arg2: memref<32x32xf32, #tpu.memory_space<vmem>>, %arg3: memref<32x32xf32, #tpu.memory_space<vmem>>, %arg4: memref<1x64xf32, #tpu.memory_space<vmem>>, %arg5: memref<64x64xf32, #tpu.memory_space<vmem>>, %arg6: memref<8x32xf32, #tpu.memory_space<vmem>>, %arg7: memref<8x32xf32, #tpu.memory_space<vmem>>, %arg8: memref<64x64xf32, #tpu.memory_space<vmem>>) attributes {dimension_semantics = [], scalar_prefetch = 0 : i64, scratch_operands = 1 : i64, tpu.core_type = #tpu.core_type<tc>} {
    %c0 = arith.constant 0 : index
    %c0_0 = arith.constant 0 : index
    %0 = vector.load %arg1[%c0, %c0_0] : memref<16x64xf32, #tpu.memory_space<vmem>>, vector<16x64xf32>
    %c0_1 = arith.constant 0 : index
    %c0_2 = arith.constant 0 : index
    %1 = vector.load %arg0[%c0_1, %c0_2] : memref<64x16xf32, #tpu.memory_space<vmem>>, vector<64x16xf32>
    %cst = arith.constant dense<0.000000e+00> : vector<64x64xf32>
    %2 = tpu.matmul %1, %0, %cst {dimension_numbers = #tpu.dot_dimension_numbers<[1], [0], [0], [1], [0, 0, 1, 1], [], []>} : vector<64x16xf32>, vector<16x64xf32>, vector<64x64xf32> -> vector<64x64xf32>
    %c0_3 = arith.constant 0 : index
    %c0_4 = arith.constant 0 : index
    %3 = vector.load %arg4[%c0_3, %c0_4] : memref<1x64xf32, #tpu.memory_space<vmem>>, vector<1x64xf32>
    %4 = vector.broadcast %3 : vector<1x64xf32> to vector<64x64xf32>
    %5 = arith.addf %2, %4 : vector<64x64xf32>
    %c0_5 = arith.constant 0 : index
    %c0_6 = arith.constant 0 : index
    %6 = vector.load %arg8[%c0_5, %c0_6] : memref<64x64xf32, #tpu.memory_space<vmem>>, vector<64x64xf32>
    tpu.vector_store %arg8[%c0_5, %c0_6], %5 {strides = array<i32>} : memref<64x64xf32, #tpu.memory_space<vmem>>, vector<64x64xf32>,
    %c0_7 = arith.constant 0 : index
    %c0_8 = arith.constant 0 : index
    %7 = vector.load %arg2[%c0_7, %c0_8] : memref<32x32xf32, #tpu.memory_space<vmem>>, vector<32x32xf32>
    %c0_9 = arith.constant 0 : index
    %c0_10 = arith.constant 0 : index
    %8 = vector.load %arg3[%c0_9, %c0_10] : memref<32x32xf32, #tpu.memory_space<vmem>>, vector<32x32xf32>
    %c56_i32 = arith.constant 56 : i32
    %9 = tpu.assume_multiple %c56_i32, 8 : i32
    %c0_11 = arith.constant 0 : index
    %c0_12 = arith.constant 0 : index
    %10 = vector.load %arg8[%c0_11, %c0_12] : memref<64x64xf32, #tpu.memory_space<vmem>>, vector<8x32xf32>
    %11 = math.tanh %10 : vector<8x32xf32>
    %12 = arith.index_cast %9 : i32 to index
    %c32 = arith.constant 32 : index
    %13 = vector.load %arg8[%12, %c32] : memref<64x64xf32, #tpu.memory_space<vmem>>, vector<8x32xf32>
    %14 = math.tanh %13 : vector<8x32xf32>
    %c0_13 = arith.constant 0 : index
    %c0_14 = arith.constant 0 : index
    %15 = vector.load %arg5[%c0_13, %c0_14] : memref<64x64xf32, #tpu.memory_space<vmem>>, vector<8x32xf32>
    tpu.vector_store %arg5[%c0_13, %c0_14], %11 {strides = array<i32>} : memref<64x64xf32, #tpu.memory_space<vmem>>, vector<8x32xf32>,
    %16 = arith.index_cast %9 : i32 to index
    %c32_15 = arith.constant 32 : index
    %17 = vector.load %arg5[%16, %c32_15] : memref<64x64xf32, #tpu.memory_space<vmem>>, vector<8x32xf32>
    tpu.vector_store %arg5[%16, %c32_15], %14 {strides = array<i32>} : memref<64x64xf32, #tpu.memory_space<vmem>>, vector<8x32xf32>,
    %c1_i32 = arith.constant 1 : i32
    %c8_i32 = arith.constant 8 : i32
    %18 = arith.muli %c1_i32, %c8_i32 : i32
    %19 = tpu.assume_multiple %18, 8 : i32
    %c7_i32 = arith.constant 7 : i32
    %20 = arith.subi %c7_i32, %c1_i32 : i32
    %c8_i32_16 = arith.constant 8 : i32
    %21 = arith.muli %20, %c8_i32_16 : i32
    %22 = tpu.assume_multiple %21, 8 : i32
    %23 = arith.index_cast %19 : i32 to index
    %c0_17 = arith.constant 0 : index
    %24 = vector.load %arg8[%23, %c0_17] : memref<64x64xf32, #tpu.memory_space<vmem>>, vector<8x32xf32>
    %cst_18 = arith.constant dense<0.000000e+00> : vector<8x32xf32>
    %25 = tpu.matmul %11, %7, %cst_18 {dimension_numbers = #tpu.dot_dimension_numbers<[1], [0], [0], [1], [0, 0, 1, 1], [], []>} : vector<8x32xf32>, vector<32x32xf32>, vector<8x32xf32> -> vector<8x32xf32>
    %26 = arith.addf %24, %25 : vector<8x32xf32>
    %27 = math.tanh %26 : vector<8x32xf32>
    %28 = arith.index_cast %22 : i32 to index
    %c32_19 = arith.constant 32 : index
    %29 = vector.load %arg8[%28, %c32_19] : memref<64x64xf32, #tpu.memory_space<vmem>>, vector<8x32xf32>
    %cst_20 = arith.constant dense<0.000000e+00> : vector<8x32xf32>
    %30 = tpu.matmul %14, %8, %cst_20 {dimension_numbers = #tpu.dot_dimension_numbers<[1], [0], [0], [1], [0, 0, 1, 1], [], []>} : vector<8x32xf32>, vector<32x32xf32>, vector<8x32xf32> -> vector<8x32xf32>
    %31 = arith.addf %29, %30 : vector<8x32xf32>
    %32 = math.tanh %31 : vector<8x32xf32>
    %33 = arith.index_cast %19 : i32 to index
    %c0_21 = arith.constant 0 : index
    %34 = vector.load %arg5[%33, %c0_21] : memref<64x64xf32, #tpu.memory_space<vmem>>, vector<8x32xf32>
    tpu.vector_store %arg5[%33, %c0_21], %27 {strides = array<i32>} : memref<64x64xf32, #tpu.memory_space<vmem>>, vector<8x32xf32>,
    %35 = arith.index_cast %22 : i32 to index
    %c32_22 = arith.constant 32 : index
    %36 = vector.load %arg5[%35, %c32_22] : memref<64x64xf32, #tpu.memory_space<vmem>>, vector<8x32xf32>
    tpu.vector_store %arg5[%35, %c32_22], %32 {strides = array<i32>} : memref<64x64xf32, #tpu.memory_space<vmem>>, vector<8x32xf32>,
    %c2_i32 = arith.constant 2 : i32
    %c8_i32_23 = arith.constant 8 : i32
    %37 = arith.muli %c2_i32, %c8_i32_23 : i32
    %38 = tpu.assume_multiple %37, 8 : i32
    %c7_i32_24 = arith.constant 7 : i32
    %39 = arith.subi %c7_i32_24, %c2_i32 : i32
    %c8_i32_25 = arith.constant 8 : i32
    %40 = arith.muli %39, %c8_i32_25 : i32
    %41 = tpu.assume_multiple %40, 8 : i32
    %42 = arith.index_cast %38 : i32 to index
    %c0_26 = arith.constant 0 : index
    %43 = vector.load %arg8[%42, %c0_26] : memref<64x64xf32, #tpu.memory_space<vmem>>, vector<8x32xf32>
    %cst_27 = arith.constant dense<0.000000e+00> : vector<8x32xf32>
    %44 = tpu.matmul %27, %7, %cst_27 {dimension_numbers = #tpu.dot_dimension_numbers<[1], [0], [0], [1], [0, 0, 1, 1], [], []>} : vector<8x32xf32>, vector<32x32xf32>, vector<8x32xf32> -> vector<8x32xf32>
    %45 = arith.addf %43, %44 : vector<8x32xf32>
    %46 = math.tanh %45 : vector<8x32xf32>
    %47 = arith.index_cast %41 : i32 to index
    %c32_28 = arith.constant 32 : index
    %48 = vector.load %arg8[%47, %c32_28] : memref<64x64xf32, #tpu.memory_space<vmem>>, vector<8x32xf32>
    %cst_29 = arith.constant dense<0.000000e+00> : vector<8x32xf32>
    %49 = tpu.matmul %32, %8, %cst_29 {dimension_numbers = #tpu.dot_dimension_numbers<[1], [0], [0], [1], [0, 0, 1, 1], [], []>} : vector<8x32xf32>, vector<32x32xf32>, vector<8x32xf32> -> vector<8x32xf32>
    %50 = arith.addf %48, %49 : vector<8x32xf32>
    %51 = math.tanh %50 : vector<8x32xf32>
    %52 = arith.index_cast %38 : i32 to index
    %c0_30 = arith.constant 0 : index
    %53 = vector.load %arg5[%52, %c0_30] : memref<64x64xf32, #tpu.memory_space<vmem>>, vector<8x32xf32>
    tpu.vector_store %arg5[%52, %c0_30], %46 {strides = array<i32>} : memref<64x64xf32, #tpu.memory_space<vmem>>, vector<8x32xf32>,
    %54 = arith.index_cast %41 : i32 to index
    %c32_31 = arith.constant 32 : index
    %55 = vector.load %arg5[%54, %c32_31] : memref<64x64xf32, #tpu.memory_space<vmem>>, vector<8x32xf32>
    tpu.vector_store %arg5[%54, %c32_31], %51 {strides = array<i32>} : memref<64x64xf32, #tpu.memory_space<vmem>>, vector<8x32xf32>,
    %c3_i32 = arith.constant 3 : i32
    %c8_i32_32 = arith.constant 8 : i32
    %56 = arith.muli %c3_i32, %c8_i32_32 : i32
    %57 = tpu.assume_multiple %56, 8 : i32
    %c7_i32_33 = arith.constant 7 : i32
    %58 = arith.subi %c7_i32_33, %c3_i32 : i32
    %c8_i32_34 = arith.constant 8 : i32
    %59 = arith.muli %58, %c8_i32_34 : i32
    %60 = tpu.assume_multiple %59, 8 : i32
    %61 = arith.index_cast %57 : i32 to index
    %c0_35 = arith.constant 0 : index
    %62 = vector.load %arg8[%61, %c0_35] : memref<64x64xf32, #tpu.memory_space<vmem>>, vector<8x32xf32>
    %cst_36 = arith.constant dense<0.000000e+00> : vector<8x32xf32>
    %63 = tpu.matmul %46, %7, %cst_36 {dimension_numbers = #tpu.dot_dimension_numbers<[1], [0], [0], [1], [0, 0, 1, 1], [], []>} : vector<8x32xf32>, vector<32x32xf32>, vector<8x32xf32> -> vector<8x32xf32>
    %64 = arith.addf %62, %63 : vector<8x32xf32>
    %65 = math.tanh %64 : vector<8x32xf32>
    %66 = arith.index_cast %60 : i32 to index
    %c32_37 = arith.constant 32 : index
    %67 = vector.load %arg8[%66, %c32_37] : memref<64x64xf32, #tpu.memory_space<vmem>>, vector<8x32xf32>
    %cst_38 = arith.constant dense<0.000000e+00> : vector<8x32xf32>
    %68 = tpu.matmul %51, %8, %cst_38 {dimension_numbers = #tpu.dot_dimension_numbers<[1], [0], [0], [1], [0, 0, 1, 1], [], []>} : vector<8x32xf32>, vector<32x32xf32>, vector<8x32xf32> -> vector<8x32xf32>
    %69 = arith.addf %67, %68 : vector<8x32xf32>
    %70 = math.tanh %69 : vector<8x32xf32>
    %71 = arith.index_cast %57 : i32 to index
    %c0_39 = arith.constant 0 : index
    %72 = vector.load %arg5[%71, %c0_39] : memref<64x64xf32, #tpu.memory_space<vmem>>, vector<8x32xf32>
    tpu.vector_store %arg5[%71, %c0_39], %65 {strides = array<i32>} : memref<64x64xf32, #tpu.memory_space<vmem>>, vector<8x32xf32>,
    %73 = arith.index_cast %60 : i32 to index
    %c32_40 = arith.constant 32 : index
    %74 = vector.load %arg5[%73, %c32_40] : memref<64x64xf32, #tpu.memory_space<vmem>>, vector<8x32xf32>
    tpu.vector_store %arg5[%73, %c32_40], %70 {strides = array<i32>} : memref<64x64xf32, #tpu.memory_space<vmem>>, vector<8x32xf32>,
    %c4_i32 = arith.constant 4 : i32
    %c8_i32_41 = arith.constant 8 : i32
    %75 = arith.muli %c4_i32, %c8_i32_41 : i32
    %76 = tpu.assume_multiple %75, 8 : i32
    %c7_i32_42 = arith.constant 7 : i32
    %77 = arith.subi %c7_i32_42, %c4_i32 : i32
    %c8_i32_43 = arith.constant 8 : i32
    %78 = arith.muli %77, %c8_i32_43 : i32
    %79 = tpu.assume_multiple %78, 8 : i32
    %80 = arith.index_cast %76 : i32 to index
    %c0_44 = arith.constant 0 : index
    %81 = vector.load %arg8[%80, %c0_44] : memref<64x64xf32, #tpu.memory_space<vmem>>, vector<8x32xf32>
    %cst_45 = arith.constant dense<0.000000e+00> : vector<8x32xf32>
    %82 = tpu.matmul %65, %7, %cst_45 {dimension_numbers = #tpu.dot_dimension_numbers<[1], [0], [0], [1], [0, 0, 1, 1], [], []>} : vector<8x32xf32>, vector<32x32xf32>, vector<8x32xf32> -> vector<8x32xf32>
    %83 = arith.addf %81, %82 : vector<8x32xf32>
    %84 = math.tanh %83 : vector<8x32xf32>
    %85 = arith.index_cast %79 : i32 to index
    %c32_46 = arith.constant 32 : index
    %86 = vector.load %arg8[%85, %c32_46] : memref<64x64xf32, #tpu.memory_space<vmem>>, vector<8x32xf32>
    %cst_47 = arith.constant dense<0.000000e+00> : vector<8x32xf32>
    %87 = tpu.matmul %70, %8, %cst_47 {dimension_numbers = #tpu.dot_dimension_numbers<[1], [0], [0], [1], [0, 0, 1, 1], [], []>} : vector<8x32xf32>, vector<32x32xf32>, vector<8x32xf32> -> vector<8x32xf32>
    %88 = arith.addf %86, %87 : vector<8x32xf32>
    %89 = math.tanh %88 : vector<8x32xf32>
    %90 = arith.index_cast %76 : i32 to index
    %c0_48 = arith.constant 0 : index
    %91 = vector.load %arg5[%90, %c0_48] : memref<64x64xf32, #tpu.memory_space<vmem>>, vector<8x32xf32>
    tpu.vector_store %arg5[%90, %c0_48], %84 {strides = array<i32>} : memref<64x64xf32, #tpu.memory_space<vmem>>, vector<8x32xf32>,
    %92 = arith.index_cast %79 : i32 to index
    %c32_49 = arith.constant 32 : index
    %93 = vector.load %arg5[%92, %c32_49] : memref<64x64xf32, #tpu.memory_space<vmem>>, vector<8x32xf32>
    tpu.vector_store %arg5[%92, %c32_49], %89 {strides = array<i32>} : memref<64x64xf32, #tpu.memory_space<vmem>>, vector<8x32xf32>,
    %c5_i32 = arith.constant 5 : i32
    %c8_i32_50 = arith.constant 8 : i32
    %94 = arith.muli %c5_i32, %c8_i32_50 : i32
    %95 = tpu.assume_multiple %94, 8 : i32
    %c7_i32_51 = arith.constant 7 : i32
    %96 = arith.subi %c7_i32_51, %c5_i32 : i32
    %c8_i32_52 = arith.constant 8 : i32
    %97 = arith.muli %96, %c8_i32_52 : i32
    %98 = tpu.assume_multiple %97, 8 : i32
    %99 = arith.index_cast %95 : i32 to index
    %c0_53 = arith.constant 0 : index
    %100 = vector.load %arg8[%99, %c0_53] : memref<64x64xf32, #tpu.memory_space<vmem>>, vector<8x32xf32>
    %cst_54 = arith.constant dense<0.000000e+00> : vector<8x32xf32>
    %101 = tpu.matmul %84, %7, %cst_54 {dimension_numbers = #tpu.dot_dimension_numbers<[1], [0], [0], [1], [0, 0, 1, 1], [], []>} : vector<8x32xf32>, vector<32x32xf32>, vector<8x32xf32> -> vector<8x32xf32>
    %102 = arith.addf %100, %101 : vector<8x32xf32>
    %103 = math.tanh %102 : vector<8x32xf32>
    %104 = arith.index_cast %98 : i32 to index
    %c32_55 = arith.constant 32 : index
    %105 = vector.load %arg8[%104, %c32_55] : memref<64x64xf32, #tpu.memory_space<vmem>>, vector<8x32xf32>
    %cst_56 = arith.constant dense<0.000000e+00> : vector<8x32xf32>
    %106 = tpu.matmul %89, %8, %cst_56 {dimension_numbers = #tpu.dot_dimension_numbers<[1], [0], [0], [1], [0, 0, 1, 1], [], []>} : vector<8x32xf32>, vector<32x32xf32>, vector<8x32xf32> -> vector<8x32xf32>
    %107 = arith.addf %105, %106 : vector<8x32xf32>
    %108 = math.tanh %107 : vector<8x32xf32>
    %109 = arith.index_cast %95 : i32 to index
    %c0_57 = arith.constant 0 : index
    %110 = vector.load %arg5[%109, %c0_57] : memref<64x64xf32, #tpu.memory_space<vmem>>, vector<8x32xf32>
    tpu.vector_store %arg5[%109, %c0_57], %103 {strides = array<i32>} : memref<64x64xf32, #tpu.memory_space<vmem>>, vector<8x32xf32>,
    %111 = arith.index_cast %98 : i32 to index
    %c32_58 = arith.constant 32 : index
    %112 = vector.load %arg5[%111, %c32_58] : memref<64x64xf32, #tpu.memory_space<vmem>>, vector<8x32xf32>
    tpu.vector_store %arg5[%111, %c32_58], %108 {strides = array<i32>} : memref<64x64xf32, #tpu.memory_space<vmem>>, vector<8x32xf32>,
    %c6_i32 = arith.constant 6 : i32
    %c8_i32_59 = arith.constant 8 : i32
    %113 = arith.muli %c6_i32, %c8_i32_59 : i32
    %114 = tpu.assume_multiple %113, 8 : i32
    %c7_i32_60 = arith.constant 7 : i32
    %115 = arith.subi %c7_i32_60, %c6_i32 : i32
    %c8_i32_61 = arith.constant 8 : i32
    %116 = arith.muli %115, %c8_i32_61 : i32
    %117 = tpu.assume_multiple %116, 8 : i32
    %118 = arith.index_cast %114 : i32 to index
    %c0_62 = arith.constant 0 : index
    %119 = vector.load %arg8[%118, %c0_62] : memref<64x64xf32, #tpu.memory_space<vmem>>, vector<8x32xf32>
    %cst_63 = arith.constant dense<0.000000e+00> : vector<8x32xf32>
    %120 = tpu.matmul %103, %7, %cst_63 {dimension_numbers = #tpu.dot_dimension_numbers<[1], [0], [0], [1], [0, 0, 1, 1], [], []>} : vector<8x32xf32>, vector<32x32xf32>, vector<8x32xf32> -> vector<8x32xf32>
    %121 = arith.addf %119, %120 : vector<8x32xf32>
    %122 = math.tanh %121 : vector<8x32xf32>
    %123 = arith.index_cast %117 : i32 to index
    %c32_64 = arith.constant 32 : index
    %124 = vector.load %arg8[%123, %c32_64] : memref<64x64xf32, #tpu.memory_space<vmem>>, vector<8x32xf32>
    %cst_65 = arith.constant dense<0.000000e+00> : vector<8x32xf32>
    %125 = tpu.matmul %108, %8, %cst_65 {dimension_numbers = #tpu.dot_dimension_numbers<[1], [0], [0], [1], [0, 0, 1, 1], [], []>} : vector<8x32xf32>, vector<32x32xf32>, vector<8x32xf32> -> vector<8x32xf32>
    %126 = arith.addf %124, %125 : vector<8x32xf32>
    %127 = math.tanh %126 : vector<8x32xf32>
    %128 = arith.index_cast %114 : i32 to index
    %c0_66 = arith.constant 0 : index
    %129 = vector.load %arg5[%128, %c0_66] : memref<64x64xf32, #tpu.memory_space<vmem>>, vector<8x32xf32>
    tpu.vector_store %arg5[%128, %c0_66], %122 {strides = array<i32>} : memref<64x64xf32, #tpu.memory_space<vmem>>, vector<8x32xf32>,
    %130 = arith.index_cast %117 : i32 to index
    %c32_67 = arith.constant 32 : index
    %131 = vector.load %arg5[%130, %c32_67] : memref<64x64xf32, #tpu.memory_space<vmem>>, vector<8x32xf32>
    tpu.vector_store %arg5[%130, %c32_67], %127 {strides = array<i32>} : memref<64x64xf32, #tpu.memory_space<vmem>>, vector<8x32xf32>,
    %c7_i32_68 = arith.constant 7 : i32
    %c8_i32_69 = arith.constant 8 : i32
    %132 = arith.muli %c7_i32_68, %c8_i32_69 : i32
    %133 = tpu.assume_multiple %132, 8 : i32
    %c7_i32_70 = arith.constant 7 : i32
    %134 = arith.subi %c7_i32_70, %c7_i32_68 : i32
    %c8_i32_71 = arith.constant 8 : i32
    %135 = arith.muli %134, %c8_i32_71 : i32
    %136 = tpu.assume_multiple %135, 8 : i32
    %137 = arith.index_cast %133 : i32 to index
    %c0_72 = arith.constant 0 : index
    %138 = vector.load %arg8[%137, %c0_72] : memref<64x64xf32, #tpu.memory_space<vmem>>, vector<8x32xf32>
    %cst_73 = arith.constant dense<0.000000e+00> : vector<8x32xf32>
    %139 = tpu.matmul %122, %7, %cst_73 {dimension_numbers = #tpu.dot_dimension_numbers<[1], [0], [0], [1], [0, 0, 1, 1], [], []>} : vector<8x32xf32>, vector<32x32xf32>, vector<8x32xf32> -> vector<8x32xf32>
    %140 = arith.addf %138, %139 : vector<8x32xf32>
    %141 = math.tanh %140 : vector<8x32xf32>
    %142 = arith.index_cast %136 : i32 to index
    %c32_74 = arith.constant 32 : index
    %143 = vector.load %arg8[%142, %c32_74] : memref<64x64xf32, #tpu.memory_space<vmem>>, vector<8x32xf32>
    %cst_75 = arith.constant dense<0.000000e+00> : vector<8x32xf32>
    %144 = tpu.matmul %127, %8, %cst_75 {dimension_numbers = #tpu.dot_dimension_numbers<[1], [0], [0], [1], [0, 0, 1, 1], [], []>} : vector<8x32xf32>, vector<32x32xf32>, vector<8x32xf32> -> vector<8x32xf32>
    %145 = arith.addf %143, %144 : vector<8x32xf32>
    %146 = math.tanh %145 : vector<8x32xf32>
    %147 = arith.index_cast %133 : i32 to index
    %c0_76 = arith.constant 0 : index
    %148 = vector.load %arg5[%147, %c0_76] : memref<64x64xf32, #tpu.memory_space<vmem>>, vector<8x32xf32>
    tpu.vector_store %arg5[%147, %c0_76], %141 {strides = array<i32>} : memref<64x64xf32, #tpu.memory_space<vmem>>, vector<8x32xf32>,
    %149 = arith.index_cast %136 : i32 to index
    %c32_77 = arith.constant 32 : index
    %150 = vector.load %arg5[%149, %c32_77] : memref<64x64xf32, #tpu.memory_space<vmem>>, vector<8x32xf32>
    tpu.vector_store %arg5[%149, %c32_77], %146 {strides = array<i32>} : memref<64x64xf32, #tpu.memory_space<vmem>>, vector<8x32xf32>,
    %c7_i32_78 = arith.constant 7 : i32
    %c0_79 = arith.constant 0 : index
    %c0_80 = arith.constant 0 : index
    %151 = vector.load %arg6[%c0_79, %c0_80] : memref<8x32xf32, #tpu.memory_space<vmem>>, vector<8x32xf32>
    tpu.vector_store %arg6[%c0_79, %c0_80], %141 {strides = array<i32>} : memref<8x32xf32, #tpu.memory_space<vmem>>, vector<8x32xf32>,
    %c0_81 = arith.constant 0 : index
    %c0_82 = arith.constant 0 : index
    %152 = vector.load %arg7[%c0_81, %c0_82] : memref<8x32xf32, #tpu.memory_space<vmem>>, vector<8x32xf32>
    tpu.vector_store %arg7[%c0_81, %c0_82], %146 {strides = array<i32>} : memref<8x32xf32, #tpu.memory_space<vmem>>, vector<8x32xf32>,
    return
  }
}

</mosaic_0001>

<bundles_post_ra>
// kernel: tpu_custom_call.1
= control target key start
LH: loop header
LB: loop body
LE: loop exit
PB: predicated region body
PF: predicated region fallthrough
CT: control target
= control target key end

     0   :  { %13 = vsyncpa [#allocation4], 0  ;;  %vm42_vm0 = vcmask 130048   ;;  %s2175_s0 = inlined_call_operand.vmem [shape: f32[64,16], index: 0, kind: input, shape index: {}]   ;;  %s2176_s1 = inlined_call_operand.vmem [shape: f32[16,64], index: 1, kind: input, shape index: {}]   ;;  %s2177_s2 = inlined_call_operand.vmem [shape: f32[32,32], index: 2, kind: input, shape index: {}]   ;;  %s2178_s3 = inlined_call_operand.vmem [shape: f32[32,32], index: 3, kind: input, shape index: {}]   ;;  %s2179_s4 = inlined_call_operand.vmem [shape: f32[1,64], index: 4, kind: input, shape index: {}]   ;;  %s2180_s5 = inlined_call_operand.hbm [shape: f32[64,64], index: 5, kind: output, shape index: {0}]   ;;  %s2181_s6 = inlined_call_operand.hbm [shape: f32[8,32], index: 6, kind: output, shape index: {1}]   ;;  %s2182_s7 = inlined_call_operand.hbm [shape: f32[8,32], index: 7, kind: output, shape index: {2}]  }
   0x1   :  { %v25_v0 = vld [vmem:[%s2176_s1] sm:$0xff]  ;;  %v26_v1 = vld [vmem:[%s2176_s1 + $0x8] sm:$0xff] }
   0x2   :  { %v27_v2 = vld [vmem:[%s2175_s0] sm:$0xff]  ;;  %v1653_v3 = vpack.c.bf16 %v26_v1, %v25_v0 }
   0x3   :  { %1487 = vmatprep.mubr.msk.f32.mxu0 %vm42_vm0, %v27_v2 }
   0x4   :  { %1654 = vmatprep.subr.bf16.mxu0 %v1653_v3 }
   0x5   :  { %14 = vsyncpa [#allocation6], 0  ;;  %1656 = vmatpush3.bf16.msra.mxu0 %v1653_v3  ;;  %v28_v4 = vld [vmem:[%s2175_s0 + $0x8] sm:$0xff]  ;;  %v29_v5 = vld [vmem:[%s2175_s0 + $0x10] sm:$0xff]  ;;  %v1853_v14 = vmov 0.0|0.0   ;;  %vm1854_vm1 = vmmov 0  }
   0x6   :  { %v30_v6 = vld [vmem:[%s2175_s0 + $0x18] sm:$0xff]  ;;  %v31_v7 = vld [vmem:[%s2175_s0 + $0x20] sm:$0xff]  ;;  %v32_v8 = vld [vmem:[%s2175_s0 + $0x28] sm:$0xff]  ;;  %1657 = vmatprep.subr.bf16.mxu1 %v1853_v14  ;;  %1669 = vmatprep.subr.bf16.mxu0 %v1853_v14  ;;  %v1855_v18 = vmov 0.0   ;;  %vm172_vm2 = vcmask 523264   ;;  %vm194_vm3 = vcmask 261120  }
   0x7   :  { %v33_v9 = vld [vmem:[%s2175_s0 + $0x30] sm:$0xff]  ;;  %v34_v10 = vld [vmem:[%s2175_s0 + $0x38] sm:$0xff]  ;;  %v181_v11 = vld [vmem:[%s2177_s2] sm:$0xff]  ;;  %1507 = vmatprep.mubr.msk.f32.mxu1 %vm1854_vm1, %v1855_v18  ;;  %vm197_vm4 = vcmask 523520   ;;  %s1857_s11 = smov 32   ;;  %s1858_s12 = smov [#allocation5]  }
   0x8   :  { %1488 = vmatmul.mubr.msk.f32.vlgmr.msra.gmra.mrb[0].mxu0 %vm42_vm0, %v28_v4  ;;  %v182_v12 = vld [vmem:[%s2177_s2 + $0x8] sm:$0xff]  ;;  %v183_v15 = vld [vmem:[%s2177_s2 + $0x10] sm:$0xff]  ;;  %v184_v16 = vld [vmem:[%s2177_s2 + $0x18] sm:$0xff]  ;;  %s1355_s13 = sshll.u32 %s1858_s12, 4  ;;  %s1356_s13 = int_to_ptr.vmem [resolvable:$true] %s1355_s13 }
   0x9   :  { %1490 = vmatprep.mubr.msk.f32.mxu0 %vm42_vm0, %v29_v5  ;;  %v1947_v13 = vpack.c.bf16 %v182_v12, %v181_v11  ;;  %v1960_v17 = vpack.c.bf16 %v184_v16, %v183_v15  ;;  %v1380_v19 = vld [vmem:[%s2179_s4] ss:$0 sm:$0xff]  ;;  %v186_v38 = vld [vmem:[%s2178_s3 + $0x8] sm:$0xff]  ;;  %v187_v40 = vld [vmem:[%s2178_s3 + $0x10] sm:$0xff]  ;;  %s1783_s14 = scalar_lea.vmem %s1356_s13, 128  ;;  %p1788_p1 = scmp.lt.s32.totalorder %s1356_s13, %s1356_s13 }
   0xa   :  { %v185_v37 = vld [vmem:[%s2178_s3] sm:$0xff]  ;;  %v188_v41 = vld [vmem:[%s2178_s3 + $0x18] sm:$0xff]  ;;  %s1856_s3 = smov 96   ;;  %p1784_p0 = scmp.ne.s32.totalorder %s1356_s13, %s1783_s14 }
   0xb   :  { %1659 = vmatpush3.bf16.msra.mxu1 %v1947_v13  ;;  %1671 = vmatpush3.bf16.msra.mxu0 %v1947_v13  ;;  %v1991_v39 = vpack.c.bf16 %v186_v38, %v185_v37  ;;  %v2005_v44 = vpack.c.bf16 %v188_v41, %v187_v40  ;;  %p1789_p2 = scmp.lt.s32.totalorder %s1783_s14, %s1783_s14 }
   0xc   :  { %1491 = vmatmul.mubr.msk.f32.gmra.mrb[2].mxu0 %vm42_vm0, %v30_v6  ;;  %1660 = vmatprep.subr.bf16.mxu1 %v1853_v14 }
   0xd   :  { %1493 = vmatprep.mubr.msk.f32.mxu0 %vm42_vm0, %v31_v7  ;;  %1672 = vmatprep.subr.bf16.mxu0 %v1853_v14  ;;  %p1790_p3 = por %p1789_p2, %p1788_p1 }
   0xf   :  { %1662 = vmatpush3.bf16.msra.mxu1 %v1960_v17  ;;  %1674 = vmatpush3.bf16.msra.mxu0 %v1960_v17  ;;  %p1791_p4 = pnand %p1790_p3, %p1784_p0 }
  0x10   :  { %1494 = vmatmul.mubr.msk.f32.gmra.mrb[4].mxu0 %vm42_vm0, %v32_v8  ;;  %1663 = vmatprep.subr.bf16.mxu1 %v1853_v14 }
  0x11   :  { %1496 = vmatprep.mubr.msk.f32.mxu0 %vm42_vm0, %v33_v9  ;;  %1681 = vmatprep.subr.bf16.mxu0 %v1853_v14 }
  0x14   :  { %1497 = vmatmul.mubr.msk.f32.gmra.mrb[6].mxu0 %vm42_vm0, %v34_v10 }
  0x15   :  { %1529 = vmatprep.mubr.msk.f32.mxu0 %vm1854_vm1, %v1855_v18 }
  0xdb   :  { %v1489_v20 = vpop.f32.mrb[0].mxu0 }
  0xdc   :  { %v139_v21 = vadd.f32 %v1489_v20, %v1380_v19  ;;  %v133_v22 = vpop.f32.mrb[1].mxu0 }
  0xdd   :  { %v134_v23 = vadd.f32 %v1380_v19, %v133_v22 }
  0xde   :  { %174 = vst.msk [vmem:[#allocation2 + $0x8] sm:$0xff] %vm172_vm2, %v139_v21 }
  0xdf   :  { %173 = vst.msk [vmem:[#allocation2] sm:$0xff] %vm172_vm2, %v134_v23  ;;  %v1492_v24 = vpop.f32.mrb[2].mxu0 }
  0xe0   :  { %v149_v25 = vadd.f32 %v1492_v24, %v1380_v19  ;;  %v143_v26 = vpop.f32.mrb[3].mxu0 }
  0xe1   :  { %v144_v27 = vadd.f32 %v1380_v19, %v143_v26 }
  0xe2   :  { %176 = vst.msk [vmem:[#allocation2 + $0x18] sm:$0xff] %vm172_vm2, %v149_v25 }
  0xe3   :  { %175 = vst.msk [vmem:[#allocation2 + $0x10] sm:$0xff] %vm172_vm2, %v144_v27  ;;  %v1495_v28 = vpop.f32.mrb[4].mxu0 }
  0xe4   :  { %v159_v29 = vadd.f32 %v1495_v28, %v1380_v19  ;;  %v153_v30 = vpop.f32.mrb[5].mxu0 }
  0xe5   :  { %v154_v31 = vadd.f32 %v1380_v19, %v153_v30  ;;  %v2021_v47 = vld [vmem:[#allocation2 + $0x8] sm:$0xff] }
  0xe6   :  { %v1978_v32 = vld [vmem:[#allocation2] sm:$0xff]  ;;  %178 = vst.msk [vmem:[#allocation2 + $0x28] sm:$0xff] %vm172_vm2, %v159_v29 }
  0xe7   :  { %1751 = vtanh.f32 %v1978_v32  ;;  %177 = vst.msk [vmem:[#allocation2 + $0x20] sm:$0xff] %vm172_vm2, %v154_v31  ;;  %v1498_v33 = vpop.f32.mrb[6].mxu0 }
  0xe8   :  { %v169_v34 = vadd.f32 %v1498_v33, %v1380_v19  ;;  %v163_v35 = vpop.f32.mrb[7].mxu0 }
  0xe9   :  { %v164_v36 = vadd.f32 %v1380_v19, %v163_v35  ;;  %v2056_v0 = vld [vmem:[#allocation2 + $0x18] sm:$0xff] }
  0xea   :  { %180 = vst.msk [vmem:[#allocation2 + $0x38] sm:$0xff] %vm172_vm2, %v169_v34  ;;  %v2033_v54 = vld [vmem:[#allocation2 + $0x10] sm:$0xff] }
  0xeb   :  { %179 = vst.msk [vmem:[#allocation2 + $0x30] sm:$0xff] %vm172_vm2, %v164_v36 }
  0xed   :  { %v441_v12 = vld [vmem:[#allocation2 + $0x28] sm:$0xff] }
  0xee   :  { %v691_v7 = vld [vmem:[#allocation2 + $0x20] sm:$0xff] }
  0xf1   :  { %v1752_v42 = vpop.eup %1751  ;;  %v1999_v43 = vld [vmem:[#allocation2 + $0x38] sm:$0xff] }
  0xf2   :  { %1508 = vmatmul.mubr.msk.f32.vlgmr.msra.gmra.mrb[0].mxu1 %vm194_vm3, %v1752_v42  ;;  %195 = vst.msk [vmem:[#allocation3] sm:$0xff] %vm194_vm3, %v1752_v42  ;;  %1753 = vtanh.f32 %v1999_v43  ;;  %v2041_v59 = vld [vmem:[#allocation2 + $0x30] sm:$0xff] }
  0xf3   :  { %1665 = vmatpush3.bf16.msra.mxu1 %v1991_v39  ;;  %1518 = vmatprep.mubr.msk.f32.mxu1 %vm1854_vm1, %v1855_v18 }
  0xf4   :  { %1666 = vmatprep.subr.bf16.mxu1 %v1853_v14 }
  0xf7   :  { %1668 = vmatpush3.bf16.msra.mxu1 %v2005_v44 }
  0xf8   :  { %1675 = vmatprep.subr.bf16.mxu1 %v1853_v14 }
  0xfc   :  { %v1754_v45 = vpop.eup %1753 }
  0xfd   :  { %279 = vrot.lane.b32.xlu0 %v1754_v45, %s1856_s3  ;;  %198 = vst.msk [vmem:[#allocation3 + $0x38] sm:$0xff] %vm197_vm4, %v1754_v45 }
 0x16f   :  { %v280_v46 = vpop.permute.xlu0 %279 }
 0x170   :  { %1519 = vmatmul.mubr.msk.f32.vlgmr.msra.gmra.mrb[2].mxu1 %vm194_vm3, %v280_v46 }
 0x171   :  { %1677 = vmatpush3.bf16.msra.mxu1 %v1991_v39  ;;  %1540 = vmatprep.mubr.msk.f32.mxu1 %vm1854_vm1, %v1855_v18 }
 0x172   :  { %1678 = vmatprep.subr.bf16.mxu1 %v1853_v14 }
 0x175   :  { %1680 = vmatpush3.bf16.msra.mxu1 %v2005_v44 }
 0x176   :  { %1687 = vmatprep.subr.bf16.mxu1 %v1853_v14 }
 0x1c5   :  { %v270_v48 = vpop.f32.mrb[0].mxu1 }
 0x1c6   :  { %v274_v49 = vadd.f32 %v270_v48, %v2021_v47  ;;  %v1509_v50 = vpop.f32.mrb[1].mxu1 }
 0x1c8   :  { %1755 = vtanh.f32 %v274_v49 }
 0x1d2   :  { %v1756_v51 = vpop.eup %1755 }
 0x1d3   :  { %360 = vst.msk [vmem:[#allocation3 + $0x8] sm:$0xff] %vm194_vm3, %v1756_v51  ;;  %1530 = vmatmul.mubr.msk.f32.vlgmr.msra.gmra.mrb[8].mxu0 %vm194_vm3, %v1756_v51 }
 0x1d4   :  { %1683 = vmatpush3.bf16.msra.mxu0 %v1947_v13  ;;  %1551 = vmatprep.mubr.msk.f32.mxu0 %vm1854_vm1, %v1855_v18 }
 0x1d5   :  { %1684 = vmatprep.subr.bf16.mxu0 %v1853_v14 }
 0x1d8   :  { %1686 = vmatpush3.bf16.msra.mxu0 %v1960_v17 }
 0x1d9   :  { %1693 = vmatprep.subr.bf16.mxu0 %v1853_v14 }
 0x243   :  { %v349_v52 = vpop.f32.mrb[2].mxu1 }
 0x244   :  { %354 = vrot.lane.b32.xlu0 %v349_v52, %s1857_s11  ;;  %v1520_v53 = vpop.f32.mrb[3].mxu1 }
 0x2a6   :  { %v434_v55 = vpop.f32.mrb[8].mxu0 }
 0x2a7   :  { %v438_v56 = vadd.f32 %v434_v55, %v2033_v54  ;;  %v1531_v57 = vpop.f32.mrb[9].mxu0 }
 0x2a9   :  { %1757 = vtanh.f32 %v438_v56 }
 0x2b3   :  { %v1758_v58 = vpop.eup %1757 }
 0x2b4   :  { %524 = vst.msk [vmem:[#allocation3 + $0x10] sm:$0xff] %vm194_vm3, %v1758_v58  ;;  %1552 = vmatmul.mubr.msk.f32.vlgmr.msra.gmra.mrb[10].mxu0 %vm194_vm3, %v1758_v58 }
 0x2b5   :  { %1695 = vmatpush3.bf16.msra.mxu0 %v1947_v13  ;;  %1573 = vmatprep.mubr.msk.f32.mxu0 %vm1854_vm1, %v1855_v18 }
 0x2b6   :  { %v355_v60 = vpop.permute.xlu0 %354  ;;  %1696 = vmatprep.subr.bf16.mxu0 %v1853_v14 }
 0x2b7   :  { %v357_v61 = vadd.f32 %v355_v60, %v2041_v59 }
 0x2b9   :  { %1759 = vtanh.f32 %v357_v61  ;;  %1698 = vmatpush3.bf16.msra.mxu0 %v1960_v17 }
 0x2ba   :  { %1705 = vmatprep.subr.bf16.mxu0 %v1853_v14 }
 0x2c3   :  { %v1760_v62 = vpop.eup %1759 }
 0x2c4   :  { %362 = vst.msk [vmem:[#allocation3 + $0x30] sm:$0xff] %vm197_vm4, %v1760_v62  ;;  %443 = vrot.lane.b32.xlu1 %v1760_v62, %s1856_s3 }
 0x336   :  { %v444_v63 = vpop.permute.xlu1 %443 }
 0x337   :  { %1541 = vmatmul.mubr.msk.f32.vlgmr.msra.gmra.mrb[4].mxu1 %vm194_vm3, %v444_v63 }
 0x338   :  { %1689 = vmatpush3.bf16.msra.mxu1 %v1991_v39  ;;  %1562 = vmatprep.mubr.msk.f32.mxu1 %vm1854_vm1, %v1855_v18 }
 0x339   :  { %1690 = vmatprep.subr.bf16.mxu1 %v1853_v14 }
 0x33c   :  { %1692 = vmatpush3.bf16.msra.mxu1 %v2005_v44 }
 0x33d   :  { %1699 = vmatprep.subr.bf16.mxu1 %v1853_v14 }
 0x387   :  { %v598_v1 = vpop.f32.mrb[10].mxu0 }
 0x388   :  { %v602_v2 = vadd.f32 %v598_v1, %v2056_v0  ;;  %v1553_v3 = vpop.f32.mrb[11].mxu0 }
 0x38a   :  { %1761 = vtanh.f32 %v602_v2 }
 0x394   :  { %v1762_v4 = vpop.eup %1761 }
 0x395   :  { %688 = vst.msk [vmem:[#allocation3 + $0x18] sm:$0xff] %vm194_vm3, %v1762_v4  ;;  %1574 = vmatmul.mubr.msk.f32.vlgmr.msra.gmra.mrb[12].mxu0 %vm194_vm3, %v1762_v4 }
 0x396   :  { %1707 = vmatpush3.bf16.msra.mxu0 %v1947_v13  ;;  %1595 = vmatprep.mubr.msk.f32.mxu0 %vm1854_vm1, %v1855_v18 }
 0x397   :  { %1708 = vmatprep.subr.bf16.mxu0 %v1853_v14 }
 0x39a   :  { %1710 = vmatpush3.bf16.msra.mxu0 %v1960_v17 }
 0x39b   :  { %1717 = vmatprep.subr.bf16.mxu0 %v1853_v14 }
 0x40a   :  { %v513_v5 = vpop.f32.mrb[4].mxu1 }
 0x40b   :  { %518 = vrot.lane.b32.xlu1 %v513_v5, %s1857_s11  ;;  %v1542_v6 = vpop.f32.mrb[5].mxu1 }
 0x468   :  { %v761_v8 = vpop.f32.mrb[12].mxu0 }
 0x469   :  { %v765_v9 = vadd.f32 %v761_v8, %v691_v7  ;;  %v1575_v10 = vpop.f32.mrb[13].mxu0 }
 0x46b   :  { %1763 = vtanh.f32 %v765_v9 }
 0x475   :  { %v1764_v11 = vpop.eup %1763 }
 0x476   :  { %1596 = vmatmul.mubr.msk.f32.vlgmr.msra.gmra.mrb[14].mxu0 %vm194_vm3, %v1764_v11 }
 0x477   :  { %1719 = vmatpush3.bf16.msra.mxu0 %v1947_v13  ;;  %1617 = vmatprep.mubr.msk.f32.mxu0 %vm1854_vm1, %v1855_v18 }
 0x478   :  { %1720 = vmatprep.subr.bf16.mxu0 %v1853_v14 }
 0x47b   :  { %1722 = vmatpush3.bf16.msra.mxu0 %v1960_v17 }
 0x47c   :  { %1729 = vmatprep.subr.bf16.mxu0 %v1853_v14 }
 0x47d   :  { %v519_v15 = vpop.permute.xlu1 %518 }
 0x47e   :  { %v521_v16 = vadd.f32 %v519_v15, %v441_v12 }
 0x480   :  { %1765 = vtanh.f32 %v521_v16 }
 0x48a   :  { %v1766_v19 = vpop.eup %1765 }
 0x48b   :  { %526 = vst.msk [vmem:[#allocation3 + $0x28] sm:$0xff] %vm197_vm4, %v1766_v19  ;;  %607 = vrot.lane.b32.xlu0 %v1766_v19, %s1856_s3 }
 0x4fd   :  { %v608_v20 = vpop.permute.xlu0 %607 }
 0x4fe   :  { %1563 = vmatmul.mubr.msk.f32.vlgmr.msra.gmra.mrb[6].mxu1 %vm194_vm3, %v608_v20 }
 0x4ff   :  { %1701 = vmatpush3.bf16.msra.mxu1 %v1991_v39  ;;  %1584 = vmatprep.mubr.msk.f32.mxu1 %vm1854_vm1, %v1855_v18 }
 0x500   :  { %1702 = vmatprep.subr.bf16.mxu1 %v1853_v14 }
 0x503   :  { %1704 = vmatpush3.bf16.msra.mxu1 %v2005_v44 }
 0x504   :  { %1711 = vmatprep.subr.bf16.mxu1 %v1853_v14 }
 0x549   :  { %v921_v21 = vpop.f32.mrb[14].mxu0 }
 0x54a   :  { %v925_v22 = vadd.f32 %v921_v21, %v441_v12  ;;  %v1597_v23 = vpop.f32.mrb[15].mxu0 }
 0x54c   :  { %1767 = vtanh.f32 %v925_v22 }
 0x556   :  { %v1768_v24 = vpop.eup %1767 }
 0x557   :  { %1009 = vst.msk [vmem:[#allocation3 + $0x28] sm:$0xff] %vm194_vm3, %v1768_v24  ;;  %1618 = vmatmul.mubr.msk.f32.vlgmr.msra.gmra.mrb[16].mxu0 %vm194_vm3, %v1768_v24 }
 0x558   :  { %1731 = vmatpush3.bf16.msra.mxu0 %v1947_v13  ;;  %1639 = vmatprep.mubr.msk.f32.mxu0 %vm1854_vm1, %v1855_v18 }
 0x559   :  { %1732 = vmatprep.subr.bf16.mxu0 %v1853_v14 }
 0x55c   :  { %1734 = vmatpush3.bf16.msra.mxu0 %v1960_v17 }
 0x5d1   :  { %v677_v25 = vpop.f32.mrb[6].mxu1 }
 0x5d2   :  { %682 = vrot.lane.b32.xlu1 %v677_v25, %s1857_s11  ;;  %v1564_v26 = vpop.f32.mrb[7].mxu1 }
 0x62a   :  { %v1081_v27 = vpop.f32.mrb[16].mxu0 }
 0x62b   :  { %v1085_v28 = vadd.f32 %v1081_v27, %v2041_v59  ;;  %v1619_v29 = vpop.f32.mrb[17].mxu0 }
 0x62d   :  { %1769 = vtanh.f32 %v1085_v28 }
 0x637   :  { %v1770_v30 = vpop.eup %1769 }
 0x638   :  { %1169 = vst.msk [vmem:[#allocation3 + $0x30] sm:$0xff] %vm194_vm3, %v1770_v30  ;;  %1640 = vmatmul.mubr.msk.f32.vlgmr.msra.gmra.mrb[18].mxu0 %vm194_vm3, %v1770_v30 }
 0x644   :  { %v683_v13 = vpop.permute.xlu1 %682 }
 0x645   :  { %v685_v31 = vadd.f32 %v691_v7, %v683_v13 }
 0x647   :  { %1771 = vtanh.f32 %v685_v31 }
 0x651   :  { %v1772_v33 = vpop.eup %1771 }
 0x652   :  { %690 = vst.msk [vmem:[#allocation3 + $0x20] sm:$0xff] %vm197_vm4, %v1772_v33  ;;  %769 = vrot.lane.b32.xlu0 %v1772_v33, %s1856_s3 }
 0x653   :  { %849 = vst.msk [vmem:[#allocation3 + $0x20] sm:$0xff] %vm194_vm3, %v1764_v11 }
 0x6c4   :  { %v770_v17 = vpop.permute.xlu0 %769 }
 0x6c5   :  { %1585 = vmatmul.mubr.msk.f32.vlgmr.msra.gmra.mrb[8].mxu1 %vm194_vm3, %v770_v17 }
 0x6c6   :  { %1713 = vmatpush3.bf16.msra.mxu1 %v1991_v39  ;;  %1606 = vmatprep.mubr.msk.f32.mxu1 %vm1854_vm1, %v1855_v18 }
 0x6c7   :  { %1714 = vmatprep.subr.bf16.mxu1 %v1853_v14 }
 0x6ca   :  { %1716 = vmatpush3.bf16.msra.mxu1 %v2005_v44 }
 0x6cb   :  { %1723 = vmatprep.subr.bf16.mxu1 %v1853_v14 }
 0x70b   :  { %v1241_v34 = vpop.f32.mrb[18].mxu0 }
 0x70c   :  { %v1245_v35 = vadd.f32 %v1241_v34, %v1999_v43  ;;  %v1641_v36 = vpop.f32.mrb[19].mxu0 }
 0x70e   :  { %1773 = vtanh.f32 %v1245_v35 }
 0x718   :  { %v1774_v37 = vpop.eup %1773 }
 0x719   :  { %1329 = vst.msk [vmem:[#allocation3 + $0x38] sm:$0xff] %vm194_vm3, %v1774_v37  ;;  %1331 = vst.msk [vmem:[#allocation5] sm:$0xff] %vm194_vm3, %v1774_v37 }
 0x798   :  { %v839_v38 = vpop.f32.mrb[8].mxu1 }
 0x799   :  { %844 = vrot.lane.b32.xlu1 %v839_v38, %s1857_s11  ;;  %v1586_v40 = vpop.f32.mrb[9].mxu1 }
 0x80b   :  { %v845_v41 = vpop.permute.xlu1 %844 }
 0x80c   :  { %v847_v42 = vadd.f32 %v845_v41, %v2056_v0 }
 0x80e   :  { %1775 = vtanh.f32 %v847_v42 }
 0x818   :  { %v1776_v45 = vpop.eup %1775 }
 0x819   :  { %850 = vst.msk [vmem:[#allocation3 + $0x18] sm:$0xff] %vm197_vm4, %v1776_v45  ;;  %929 = vrot.lane.b32.xlu0 %v1776_v45, %s1856_s3 }
 0x88b   :  { %v930_v43 = vpop.permute.xlu0 %929 }
 0x88c   :  { %1607 = vmatmul.mubr.msk.f32.vlgmr.msra.gmra.mrb[10].mxu1 %vm194_vm3, %v930_v43 }
 0x88d   :  { %1725 = vmatpush3.bf16.msra.mxu1 %v1991_v39  ;;  %1628 = vmatprep.mubr.msk.f32.mxu1 %vm1854_vm1, %v1855_v18 }
 0x88e   :  { %1726 = vmatprep.subr.bf16.mxu1 %v1853_v14 }
 0x891   :  { %1728 = vmatpush3.bf16.msra.mxu1 %v2005_v44 }
 0x892   :  { %1735 = vmatprep.subr.bf16.mxu1 %v1853_v14 }
 0x95f   :  { %v999_v46 = vpop.f32.mrb[10].mxu1 }
 0x960   :  { %1004 = vrot.lane.b32.xlu1 %v999_v46, %s1857_s11  ;;  %v1608_v48 = vpop.f32.mrb[11].mxu1 }
 0x9d2   :  { %v1005_v49 = vpop.permute.xlu1 %1004 }
 0x9d3   :  { %v1007_v50 = vadd.f32 %v1005_v49, %v2033_v54 }
 0x9d5   :  { %1777 = vtanh.f32 %v1007_v50 }
 0x9df   :  { %v1778_v51 = vpop.eup %1777 }
 0x9e0   :  { %1010 = vst.msk [vmem:[#allocation3 + $0x10] sm:$0xff] %vm197_vm4, %v1778_v51  ;;  %1089 = vrot.lane.b32.xlu0 %v1778_v51, %s1856_s3 }
 0xa52   :  { %v1090_v52 = vpop.permute.xlu0 %1089 }
 0xa53   :  { %1629 = vmatmul.mubr.msk.f32.vlgmr.msra.gmra.mrb[12].mxu1 %vm194_vm3, %v1090_v52 }
 0xa54   :  { %1737 = vmatpush3.bf16.msra.mxu1 %v1991_v39  ;;  %1650 = vmatprep.mubr.msk.f32.mxu1 %vm1854_vm1, %v1855_v18 }
 0xa55   :  { %1738 = vmatprep.subr.bf16.mxu1 %v1853_v14 }
 0xa58   :  { %1740 = vmatpush3.bf16.msra.mxu1 %v2005_v44 }
 0xb26   :  { %v1159_v53 = vpop.f32.mrb[12].mxu1 }
 0xb27   :  { %1164 = vrot.lane.b32.xlu1 %v1159_v53, %s1857_s11  ;;  %v1630_v54 = vpop.f32.mrb[13].mxu1 }
 0xb99   :  { %v1165_v55 = vpop.permute.xlu1 %1164 }
 0xb9a   :  { %v1167_v56 = vadd.f32 %v1165_v55, %v2021_v47 }
 0xb9c   :  { %1779 = vtanh.f32 %v1167_v56 }
 0xba6   :  { %v1780_v57 = vpop.eup %1779 }
 0xba7   :  { %1170 = vst.msk [vmem:[#allocation3 + $0x8] sm:$0xff] %vm197_vm4, %v1780_v57  ;;  %1249 = vrot.lane.b32.xlu0 %v1780_v57, %s1856_s3 }
 0xc19   :  { %v1250_v39 = vpop.permute.xlu0 %1249 }
 0xc1a   :  { %1651 = vmatmul.mubr.msk.f32.vlgmr.msra.gmra.mrb[14].mxu1 %vm194_vm3, %v1250_v39 }
 0xced   :  { %v1319_v18 = vpop.f32.mrb[14].mxu1 }
 0xcee   :  { %1324 = vrot.lane.b32.xlu1 %v1319_v18, %s1857_s11  ;;  %v1652_v14 = vpop.f32.mrb[15].mxu1 }
 0xd60   :  { %v1325_v44 = vpop.permute.xlu1 %1324 }
 0xd61   :  { %v1327_v58 = vadd.f32 %v1325_v44, %v1978_v32 }
 0xd62   :  { %1794 = shalt.err (!%p1791_p4)
}
 0xd63   :  { %s1795_s17 = scalar_lea.hbm %s2181_s6, 128 }
 0xd64   :  { %p1796_p5 = scmp.ne.s32.totalorder %s2181_s6, %s1795_s17  ;;  %p1799_p6 = scmp.lt.u32.totalorder %s1795_s17, %s2181_s6 }
 0xd66   :  { %p1801_p7 = pnand %p1799_p6, %p1796_p5 }
 0xd68   :  { %1804 = shalt.err (!%p1801_p7)
}
 0xd69   :  { %1358 = dma.vmem_to_hbm [thread:$0]  %s1356_s13, 128, %s2181_s6, [#allocation6]   ;;  %1781 = vtanh.f32 %v1327_v58 }
 0xd6a   :  { %s1859_s0 = smov [#allocation3]  }
 0xd6b   :  { %s1342_s24 = sshll.u32 %s1859_s0, 4  ;;  %s1343_s24 = int_to_ptr.vmem [resolvable:$true] %s1342_s24 }
 0xd6c   :  { %s1805_s25 = scalar_lea.vmem %s1343_s24, 1024  ;;  %p1810_p9 = scmp.lt.s32.totalorder %s1343_s24, %s1343_s24 }
 0xd6d   :  { %p1806_p8 = scmp.ne.s32.totalorder %s1343_s24, %s1805_s25  ;;  %p1811_p10 = scmp.lt.s32.totalorder %s1805_s25, %s1805_s25 }
 0xd6f   :  { %p1812_p11 = por %p1811_p10, %p1810_p9 }
 0xd71   :  { %p1813_p12 = pnand %p1812_p11, %p1806_p8 }
 0xd73   :  { %v1782_v32 = vpop.eup %1781 }
 0xd74   :  { %1330 = vst.msk [vmem:[#allocation3] sm:$0xff] %vm197_vm4, %v1782_v32  ;;  %1333 = vrot.lane.b32.xlu0 %v1782_v32, %s1856_s3 }
 0xd75   :  { %1816 = shalt.err (!%p1813_p12)
}
 0xd76   :  { %s1817_s6 = scalar_lea.hbm %s2180_s5, 1024 }
 0xd77   :  { %p1818_p13 = scmp.ne.s32.totalorder %s2180_s5, %s1817_s6  ;;  %p1821_p0 = scmp.lt.u32.totalorder %s1817_s6, %s2180_s5 }
 0xd79   :  { %p1823_p1 = pnand %p1821_p0, %p1818_p13 }
 0xd7b   :  { %1826 = shalt.err (!%p1823_p1)
}
 0xd7c   :  { %s1860_s30 = smov 128   ;;  %s1861_s8 = smov 8  }
 0xd7d   :  { %1348 = dma.vmem_to_hbm [thread:$0]  %s1343_s24, 1024, %s2180_s5, [#allocation4], %s1860_s30, %s1860_s30, %s1861_s8  }
 0xd7e   :  { %s1862_s1 = smov [#allocation7]  }
 0xd7f   :  { %s1365_s3 = sshll.u32 %s1862_s1, 4  ;;  %s1366_s3 = int_to_ptr.vmem [resolvable:$true] %s1365_s3 }
 0xd80   :  { %s1827_s11 = scalar_lea.vmem %s1366_s3, 128  ;;  %p1832_p3 = scmp.lt.s32.totalorder %s1366_s3, %s1366_s3 }
 0xd81   :  { %p1828_p2 = scmp.ne.s32.totalorder %s1366_s3, %s1827_s11  ;;  %p1833_p4 = scmp.lt.s32.totalorder %s1827_s11, %s1827_s11 }
 0xd83   :  { %p1834_p5 = por %p1833_p4, %p1832_p3 }
 0xd85   :  { %p1835_p6 = pnand %p1834_p5, %p1828_p2 }
 0xde6   :  { %v1334_v47 = vpop.permute.xlu0 %1333 }
 0xde7   :  { %1336 = vst.msk [vmem:[#allocation7] sm:$0xff] %vm194_vm3, %v1334_v47 }
 0xde8   :  { %1838 = shalt.err (!%p1835_p6)
}
 0xde9   :  { %s1839_s14 = scalar_lea.hbm %s2182_s7, 128 }
 0xdea   :  { %p1840_p7 = scmp.ne.s32.totalorder %s2182_s7, %s1839_s14  ;;  %p1843_p8 = scmp.lt.u32.totalorder %s1839_s14, %s2182_s7 }
 0xdec   :  { %p1845_p9 = pnand %p1843_p8, %p1840_p7 }
 0xdee   :  { %1848 = shalt.err (!%p1845_p9)
}
 0xdef   :  { %1368 = dma.vmem_to_hbm [thread:$0]  %s1366_s3, 128, %s2182_s7, [#allocation6]  }
 0xdf0   :  { %1849 = dma.done.wait [#allocation4], 1024  }
 0xdf1   :  { %1850 = vsyncadd [#allocation4], 4294966272 }
 0xdf2   :  { %1851 = dma.done.wait [#allocation6], 256  }
 0xdf3   :  { %1852 = vsyncadd [#allocation6], 4294967040 }
 0xdf4   :  { %1378 = vsyncpa [#allocation4], 1 }
 0xdf5   :  { %1379 = vsyncpa [#allocation6], 1 }

</bundles_post_ra>
